<compile_context>
chip_gen: v7x
topology: tpu7x:2x2x1
jax: 0.10.0
libtpu: 0.0.40
codegen_flags: <defaults>
</compile_context>

<pallas_src>
import functools

import jax
import jax.numpy as jnp
from jax import lax
from jax.experimental import pallas as pl
from jax.experimental.pallas import tpu as pltpu


_LANES = 128
_NUM_STATS = 5   # A, T1, P, T2, S


def _nce_tile_kernel(f1_ref, f2t_ref, labi_ref, labj_ref, out_ref, *,
                     gamma, inv_t, n_valid_cols, tk, n_chunks,
                     f2_resident, mask_cols):
    j = pl.program_id(1)

    # Resident per-row-tile accumulator block: zero on the first column step.
    @pl.when(j == 0)
    def _():
        out_ref[...] = jnp.zeros_like(out_ref)

    # RHS tile: j-th (C, tk) slab of the VMEM-resident (n_col_tiles, C, tk)
    # buffer, or the already-windowed (1, C, tk) block.
    rhs = f2t_ref[j if f2_resident else 0]                   # (C, tk) bf16

    # (tm, C) @ (C, tk) on the MXU, bf16 operands, f32 accumulation.
    sim = jnp.dot(f1_ref[...], rhs, preferred_element_type=jnp.float32)

    lab_i = labi_ref[...]                                    # (tm, 1) int32
    use_int_pow = float(gamma).is_integer() and gamma >= 1.0
    # TODO(synk): gamma == 0 degenerate case (torch's 0**0 == 1 on masked-out
    # entries) is not reproduced by the fused select below.

    # Walk the tile in 128-lane chunks: every O(tm*tk) op stays on VPU/EUP and
    # folds into five lane-dense (tm, 128) accumulators in the resident output
    # block; the cross-lane (XLU) reduction happens once, in the XLA epilogue.
    for c in range(n_chunks):
        lo = c * _LANES
        sim_c = jnp.clip(sim[:, lo:lo + _LANES], -1.0, 1.0)  # (tm, 128) f32
        lab_j = labj_ref[:, lo:lo + _LANES]                  # (1, 128) int32
        eq = lab_i == lab_j                                  # (tm, 128) bool

        logit = jnp.exp(sim_c * inv_t)                       # EUP
        if mask_cols:
            col_ok = (j * tk + lo + lax.broadcasted_iota(
                jnp.int32, (1, _LANES), 1)) < n_valid_cols
            pos = jnp.logical_and(eq, col_ok)
            lg = jnp.where(col_ok, logit, 0.0)
        else:
            pos = eq
            lg = logit

        # Shared powered term: (1-sim)^g on positive pairs, max(sim,0)^g on
        # negative pairs (sim already clipped to [-1, 1]).
        base = jnp.where(eq, 1.0 - sim_c, jnp.maximum(sim_c, 0.0))
        if use_int_pow:
            pw = lax.integer_pow(base, int(gamma))
        else:
            pw = jnp.power(base, gamma)
        lgpw = lg * pw

        out_ref[:, 0 * _LANES:1 * _LANES] += jnp.where(pos, lgpw, 0.0)   # A
        out_ref[:, 1 * _LANES:2 * _LANES] += lgpw                        # T1
        out_ref[:, 2 * _LANES:3 * _LANES] += jnp.where(pos, lg, 0.0)     # P
        out_ref[:, 3 * _LANES:4 * _LANES] += lg                          # T2
        out_ref[:, 4 * _LANES:5 * _LANES] += jnp.where(pos, sim_c, 0.0)  # S


def _round_up(x, m):
    return (x + m - 1) // m * m


def _pick_row_tile(n, requested):
    """Row tile: multiple of 16 (bf16 sublanes); rows padded to tm (no lcm)."""
    cap = max(16, _round_up(n, 16))
    if requested is not None:
        tm = max(16, _round_up(min(int(requested), cap), 16))
        return tm, _round_up(n, tm)
    tm = min(512, cap)
    while tm > 16:
        n_pad = _round_up(n, tm)
        waste_ok = (n_pad - n) * 4 <= n_pad                  # <= 25% padded rows
        enough_tiles = (n_pad // tm >= 2) or (n <= 256)      # v7x megacore
        if waste_ok and enough_tiles:
            break
        tm = max(16, _round_up(tm // 2, 16))
    return tm, _round_up(n, tm)


def _pick_col_tile(n, requested):
    """Column tile: multiple of 128 (lane width); cols padded to tk."""
    cap = max(_LANES, _round_up(n, _LANES))
    if requested is not None:
        tk = max(_LANES, (min(int(requested), cap) // _LANES) * _LANES)
        return tk, _round_up(n, tk)
    tk = min(512, cap)
    while tk > _LANES and (_round_up(n, tk) - n) * 4 > _round_up(n, tk):
        tk -= _LANES
    return tk, _round_up(n, tk)


def _vmem_budget_bytes():
    try:
        cap = int(pltpu.get_tpu_info().vmem_capacity_bytes)
    except Exception:
        cap = 64 * 1024 * 1024                                # v7x-safe fallback
    return max(32 * 1024 * 1024, min(cap * 3 // 4, 100 * 1024 * 1024))


def _estimate_vmem_bytes(tm, tk, c, n_cols_pad, itemsize, f2_resident):
    est = 2 * tm * c * itemsize                               # f1 (dbl-buffered)
    est += 2 * c * (n_cols_pad if f2_resident else tk) * itemsize
    est += 2 * tm * _NUM_STATS * _LANES * 4                   # packed accumulators
    est += tm * tk * 4                                        # sim tile
    est += 6 * tm * _LANES * 4                                # chunk temporaries
    est += 4 * (tm + tk + 2 * _LANES) * 4                     # label tiles, misc
    return est


def curricular_nce_loss2(feature1, feature2, labels, *, gamma, T=0.07,
                         alpha=0.01, t_prev=0.0, matmul_dtype=jnp.bfloat16,
                         block_rows=None, block_cols=None, f2_resident=None):
    """Returns (loss: scalar f32, keep_weight: f32[1]) like the torch module."""
    N, C = feature1.shape

    # ---- O(N*C) prologue in plain JAX: normalize once, retile f2, cast.
    def _l2_normalize(x):
        x = x.astype(jnp.float32)
        ss = jnp.sum(x * x, axis=1, keepdims=True)
        return x * lax.rsqrt(jnp.maximum(ss, 1e-24))   # == x / max(||x||, 1e-12)

    f1n = _l2_normalize(feature1).astype(matmul_dtype)          # (N, C)
    f2n = _l2_normalize(feature2).astype(matmul_dtype)          # (N, C)
    labels_i32 = labels.astype(jnp.int32)

    # ---- Independent row/column padding (no lcm padding, no dead tiles).
    tm, n_rows_pad = _pick_row_tile(N, block_rows)
    tk, n_cols_pad = _pick_col_tile(N, block_cols)
    n_chunks = tk // _LANES
    n_col_tiles = n_cols_pad // tk
    grid = (n_rows_pad // tm, n_col_tiles)

    f1n = jnp.pad(f1n, ((0, n_rows_pad - N), (0, 0)))
    # feature2 as (n_col_tiles, C, tk): lane-dense RHS tiles, no in-kernel
    # transpose.  (Avoiding this XLA-side transpose entirely via dot_general
    # contracting dim 1 is a verify-first follow-up.)
    f2p = jnp.pad(f2n, ((0, n_cols_pad - N), (0, 0)))
    f2t = f2p.reshape(n_col_tiles, tk, C).transpose(0, 2, 1)    # (nt, C, tk)
    lab_col = jnp.pad(labels_i32, (0, n_rows_pad - N)).reshape(n_rows_pad, 1)
    lab_row = jnp.pad(labels_i32, (0, n_cols_pad - N)).reshape(1, n_cols_pad)

    # ---- feature2 residency + per-generation VMEM sizing (v7x has 64 MiB).
    itemsize = jnp.dtype(matmul_dtype).itemsize
    budget = _vmem_budget_bytes()
    auto_res = f2_resident is None
    if auto_res:
        f2_resident = (grid[0] > 1 and
                       2 * C * n_cols_pad * itemsize
                       <= min(16 * 1024 * 1024, budget // 4))
    f2_resident = bool(f2_resident)
    est = _estimate_vmem_bytes(tm, tk, C, n_cols_pad, itemsize, f2_resident)
    if auto_res and f2_resident and est > budget:
        f2_resident = False
        est = _estimate_vmem_bytes(tm, tk, C, n_cols_pad, itemsize, False)
    vmem_limit = int(min(budget, max(32 * 1024 * 1024, 2 * est)))

    kernel = functools.partial(
        _nce_tile_kernel, gamma=float(gamma), inv_t=float(1.0 / T),
        n_valid_cols=N, tk=tk, n_chunks=n_chunks, f2_resident=f2_resident,
        mask_cols=(n_cols_pad != N))

    if f2_resident:
        f2_spec = pl.BlockSpec((n_col_tiles, C, tk), lambda i, j: (0, 0, 0))
    else:
        f2_spec = pl.BlockSpec((1, C, tk), lambda i, j: (j, 0, 0))

    out = pl.pallas_call(
        kernel,
        grid=grid,
        in_specs=[
            pl.BlockSpec((tm, C), lambda i, j: (i, 0)),        # f1 row tile
            f2_spec,                                           # f2 column tiles
            pl.BlockSpec((tm, 1), lambda i, j: (i, 0)),        # row labels
            pl.BlockSpec((1, tk), lambda i, j: (0, j)),        # column labels
        ],
        out_specs=pl.BlockSpec((tm, _NUM_STATS * _LANES), lambda i, j: (i, 0)),
        out_shape=jax.ShapeDtypeStruct((n_rows_pad, _NUM_STATS * _LANES),
                                       jnp.float32),
        compiler_params=pltpu.CompilerParams(
            dimension_semantics=("parallel", "arbitrary"),
            vmem_limit_bytes=vmem_limit),
    )(f1n, f2t, lab_col, lab_row)

    # ---- O(N) epilogue in plain JAX (final lane reduce + keep_weight algebra).
    stats = out[:N].reshape(N, _NUM_STATS, _LANES).sum(axis=2)
    a, t1, p, t2, s = (stats[:, k] for k in range(_NUM_STATS))
    # B/Q are sums of non-negative terms; the clamp only guards f32 cancellation.
    b = jnp.maximum(t1 - a, 0.0)
    q = jnp.maximum(t2 - p, 0.0)

    # Positive-pair count (incl. the diagonal), O(N log N) from the labels.
    sl = jnp.sort(labels_i32)
    per_row_cnt = (jnp.searchsorted(sl, sl, side="right")
                   - jnp.searchsorted(sl, sl, side="left"))
    pos_cnt = jnp.sum(per_row_cnt.astype(jnp.float32))

    t_prev = jnp.asarray(t_prev, jnp.float32)
    t = jnp.sum(s) / pos_cnt * alpha + (1.0 - alpha) * t_prev
    keep_weight = 1.0 - t

    l_pos = a + keep_weight * p
    l_neg = b + keep_weight * q
    loss = -jnp.sum(jnp.log(l_pos / (l_neg + l_pos))) / N
    return loss, keep_weight.reshape(1)


def _reference(feature1, feature2, labels, gamma, T=0.07, alpha=0.01,
               t_prev=0.0):
    """Pure-JAX f32 transcription of the PyTorch forward, for validation."""
    def normalize(x):
        n = jnp.sqrt(jnp.sum(x * x, axis=1, keepdims=True))
        return x / jnp.maximum(n, 1e-12)

    f1 = normalize(feature1.astype(jnp.float32))
    f2 = normalize(feature2.astype(jnp.float32))
    sim = jnp.clip(f1 @ f2.T, -1.0, 1.0)
    logits = jnp.exp(sim / T)
    pos = (labels[:, None] == labels[None, :]).astype(jnp.float32)
    neg = 1.0 - pos
    t = jnp.sum(sim * pos) / jnp.sum(pos) * alpha + (1.0 - alpha) * t_prev
    kw = 1.0 - t
    diff_pos = (pos - sim * pos) ** gamma + pos * kw
    diff_neg = jnp.clip(sim * neg, 0.0, 1.0) ** gamma + neg * kw
    l_pos = jnp.sum(logits * diff_pos, axis=1)
    l_neg = jnp.sum(logits * diff_neg, axis=1)
    loss = -jnp.sum(jnp.log(l_pos / (l_neg + l_pos))) / feature1.shape[0]
    return loss, kw


def _run_case(key, N, C, gamma, **kw):
    k1, k2, k3 = jax.random.split(key, 3)
    feature1 = jax.random.normal(k1, (N, C), dtype=jnp.float32)
    feature2 = jax.random.normal(k2, (N, C), dtype=jnp.float32)
    labels = jax.random.randint(k3, (N,), 0, 3, dtype=jnp.int32)

    loss, keep_weight = curricular_nce_loss2(feature1, feature2, labels,
                                             gamma=gamma, **kw)
    jax.block_until_ready((loss, keep_weight))

    ref_loss, ref_kw = _reference(feature1, feature2, labels, gamma)
    assert jnp.allclose(loss, ref_loss, rtol=5e-2, atol=5e-2), (
        N, C, float(loss), float(ref_loss))
    assert jnp.allclose(keep_weight[0], ref_kw, rtol=5e-2, atol=5e-2), (
        N, C, float(keep_weight[0]), float(ref_kw))


if __name__ == "__main__":
    key = jax.random.PRNGKey(0)
    gamma = 2.0  # constructor arg of CurricularNCE_loss2

    # 1) tiny single-tile case (rows padded 8->16, cols 8->128, masked)
    _run_case(key, N=8, C=32, gamma=gamma)
    # 2) padding + column-validity masks (N=12)
    _run_case(jax.random.fold_in(key, 1), N=12, C=32, gamma=gamma)
    # 3) multi-tile grid, VMEM-resident f2, accumulation across column tiles
    _run_case(jax.random.fold_in(key, 2), N=200, C=32, gamma=gamma,
              block_rows=64, block_cols=128)
    # 4) multiple 128-lane chunks per tile + streamed (non-resident) f2
    _run_case(jax.random.fold_in(key, 3), N=260, C=64, gamma=gamma,
              block_cols=256, f2_resident=False)

    print("KERNEL_OK")
</pallas_src>

<mosaic_0001>
module attributes {stable_mosaic.version = 11 : i64} {
  func.func @_nce_tile_kernel(%arg0: i32, %arg1: i32, %arg2: memref<16x32xbf16, #tpu.memory_space<vmem>>, %arg3: memref<1x32x128xbf16, #tpu.memory_space<vmem>>, %arg4: memref<16x1xi32, #tpu.memory_space<vmem>>, %arg5: memref<1x128xi32, #tpu.memory_space<vmem>>, %arg6: memref<16x640xf32, #tpu.memory_space<vmem>>) attributes {dimension_semantics = [#tpu.dimension_semantics<parallel>, #tpu.dimension_semantics<arbitrary>], iteration_bounds = array<i64: 1, 1>, scalar_prefetch = 0 : i64, scratch_operands = 0 : i64, tpu.core_type = #tpu.core_type<tc>, window_params = [{transform_indices = @transform_0, window_bounds = array<i64: 16, 32>}, {transform_indices = @transform_1, window_bounds = array<i64: 1, 32, 128>}, {transform_indices = @transform_2, window_bounds = array<i64: 16, 1>}, {transform_indices = @transform_3, window_bounds = array<i64: 1, 128>}, {transform_indices = @transform_4, window_bounds = array<i64: 16, 640>}]} {
    %c0_i32 = arith.constant 0 : i32
    %0 = arith.cmpi eq, %arg1, %c0_i32 : i32
    %1 = arith.extui %0 : i1 to i32
    %c0_i32_0 = arith.constant 0 : i32
    %2 = arith.cmpi ne, %1, %c0_i32_0 : i32
    scf.if %2 {
      %cst_35 = arith.constant 0.000000e+00 : f32
      %60 = vector.broadcast %cst_35 : f32 to vector<16x640xf32>
      %c0_36 = arith.constant 0 : index
      %c0_37 = arith.constant 0 : index
      %61 = vector.load %arg6[%c0_36, %c0_37] : memref<16x640xf32, #tpu.memory_space<vmem>>, vector<16x640xf32>
      tpu.vector_store %arg6[%c0_36, %c0_37], %60 {strides = array<i32>} : memref<16x640xf32, #tpu.memory_space<vmem>>, vector<16x640xf32>,
    } else {
    }
    %c0 = arith.constant 0 : index
    %c0_1 = arith.constant 0 : index
    %c0_2 = arith.constant 0 : index
    %3 = vector.load %arg3[%c0, %c0_1, %c0_2] : memref<1x32x128xbf16, #tpu.memory_space<vmem>>, vector<1x32x128xbf16>
    %4 = vector.shape_cast %3 : vector<1x32x128xbf16> to vector<32x128xbf16>
    %c0_3 = arith.constant 0 : index
    %c0_4 = arith.constant 0 : index
    %5 = vector.load %arg2[%c0_3, %c0_4] : memref<16x32xbf16, #tpu.memory_space<vmem>>, vector<16x32xbf16>
    %cst = arith.constant dense<0.000000e+00> : vector<16x128xf32>
    %6 = tpu.matmul %5, %4, %cst {dimension_numbers = #tpu.dot_dimension_numbers<[1], [0], [0], [1], [0, 0, 1, 1], [], []>} : vector<16x32xbf16>, vector<32x128xbf16>, vector<16x128xf32> -> vector<16x128xf32>
    %c0_5 = arith.constant 0 : index
    %c0_6 = arith.constant 0 : index
    %7 = vector.load %arg4[%c0_5, %c0_6] : memref<16x1xi32, #tpu.memory_space<vmem>>, vector<16x1xi32>
    %cst_7 = arith.constant -1.000000e+00 : f32
    %cst_8 = arith.constant 1.000000e+00 : f32
    %8 = vector.broadcast %cst_7 : f32 to vector<16x128xf32>
    %9 = arith.maximumf %8, %6 : vector<16x128xf32>
    %10 = vector.broadcast %cst_8 : f32 to vector<16x128xf32>
    %11 = arith.minimumf %10, %9 : vector<16x128xf32>
    %c0_9 = arith.constant 0 : index
    %c0_10 = arith.constant 0 : index
    %12 = vector.load %arg5[%c0_9, %c0_10] : memref<1x128xi32, #tpu.memory_space<vmem>>, vector<1x128xi32>
    %13 = vector.broadcast %7 : vector<16x1xi32> to vector<16x128xi32>
    %14 = vector.broadcast %12 : vector<1x128xi32> to vector<16x128xi32>
    %15 = arith.cmpi eq, %13, %14 : vector<16x128xi32>
    %cst_11 = arith.constant 14.2857141 : f32
    %16 = vector.broadcast %cst_11 : f32 to vector<16x128xf32>
    %17 = arith.mulf %11, %16 : vector<16x128xf32>
    %18 = math.exp %17 : vector<16x128xf32>
    %c128_i32 = arith.constant 128 : i32
    %19 = arith.muli %arg1, %c128_i32 : i32
    %c0_i32_12 = arith.constant 0 : i32
    %20 = arith.addi %19, %c0_i32_12 : i32
    %21 = tpu.iota {dimensions = array<i32: 1>} : vector<1x128xi32>
    %22 = vector.broadcast %20 : i32 to vector<1x128xi32>
    %23 = arith.addi %22, %21 : vector<1x128xi32>
    %c8_i32 = arith.constant 8 : i32
    %24 = vector.broadcast %c8_i32 : i32 to vector<1x128xi32>
    %25 = arith.cmpi slt, %23, %24 : vector<1x128xi32>
    %26 = vector.broadcast %25 : vector<1x128xi1> to vector<16x128xi1>
    %27 = arith.andi %15, %26 : vector<16x128xi1>
    %cst_13 = arith.constant 0.000000e+00 : f32
    %28 = vector.shape_cast %25 : vector<1x128xi1> to vector<1x128xi1>
    %29 = vector.broadcast %28 : vector<1x128xi1> to vector<16x128xi1>
    %30 = vector.broadcast %cst_13 : f32 to vector<16x128xf32>
    %31 = arith.select %29, %18, %30 : vector<16x128xi1>, vector<16x128xf32>
    %cst_14 = arith.constant 1.000000e+00 : f32
    %32 = vector.broadcast %cst_14 : f32 to vector<16x128xf32>
    %33 = arith.subf %32, %11 : vector<16x128xf32>
    %cst_15 = arith.constant 0.000000e+00 : f32
    %34 = vector.broadcast %cst_15 : f32 to vector<16x128xf32>
    %35 = arith.maximumf %11, %34 : vector<16x128xf32>
    %36 = arith.select %15, %33, %35 : vector<16x128xi1>, vector<16x128xf32>
    %37 = arith.mulf %36, %36 : vector<16x128xf32>
    %38 = arith.mulf %31, %37 : vector<16x128xf32>
    %c0_16 = arith.constant 0 : index
    %c0_17 = arith.constant 0 : index
    %39 = vector.load %arg6[%c0_16, %c0_17] : memref<16x640xf32, #tpu.memory_space<vmem>>, vector<16x128xf32>
    %cst_18 = arith.constant 0.000000e+00 : f32
    %40 = vector.broadcast %cst_18 : f32 to vector<16x128xf32>
    %41 = arith.select %27, %38, %40 : vector<16x128xi1>, vector<16x128xf32>
    %42 = arith.addf %39, %41 : vector<16x128xf32>
    %c0_19 = arith.constant 0 : index
    %c0_20 = arith.constant 0 : index
    %43 = vector.load %arg6[%c0_19, %c0_20] : memref<16x640xf32, #tpu.memory_space<vmem>>, vector<16x128xf32>
    tpu.vector_store %arg6[%c0_19, %c0_20], %42 {strides = array<i32>} : memref<16x640xf32, #tpu.memory_space<vmem>>, vector<16x128xf32>,
    %c0_21 = arith.constant 0 : index
    %c128 = arith.constant 128 : index
    %44 = vector.load %arg6[%c0_21, %c128] : memref<16x640xf32, #tpu.memory_space<vmem>>, vector<16x128xf32>
    %45 = arith.addf %44, %38 : vector<16x128xf32>
    %c0_22 = arith.constant 0 : index
    %c128_23 = arith.constant 128 : index
    %46 = vector.load %arg6[%c0_22, %c128_23] : memref<16x640xf32, #tpu.memory_space<vmem>>, vector<16x128xf32>
    tpu.vector_store %arg6[%c0_22, %c128_23], %45 {strides = array<i32>} : memref<16x640xf32, #tpu.memory_space<vmem>>, vector<16x128xf32>,
    %c0_24 = arith.constant 0 : index
    %c256 = arith.constant 256 : index
    %47 = vector.load %arg6[%c0_24, %c256] : memref<16x640xf32, #tpu.memory_space<vmem>>, vector<16x128xf32>
    %cst_25 = arith.constant 0.000000e+00 : f32
    %48 = vector.broadcast %cst_25 : f32 to vector<16x128xf32>
    %49 = arith.select %27, %31, %48 : vector<16x128xi1>, vector<16x128xf32>
    %50 = arith.addf %47, %49 : vector<16x128xf32>
    %c0_26 = arith.constant 0 : index
    %c256_27 = arith.constant 256 : index
    %51 = vector.load %arg6[%c0_26, %c256_27] : memref<16x640xf32, #tpu.memory_space<vmem>>, vector<16x128xf32>
    tpu.vector_store %arg6[%c0_26, %c256_27], %50 {strides = array<i32>} : memref<16x640xf32, #tpu.memory_space<vmem>>, vector<16x128xf32>,
    %c0_28 = arith.constant 0 : index
    %c384 = arith.constant 384 : index
    %52 = vector.load %arg6[%c0_28, %c384] : memref<16x640xf32, #tpu.memory_space<vmem>>, vector<16x128xf32>
    %53 = arith.addf %52, %31 : vector<16x128xf32>
    %c0_29 = arith.constant 0 : index
    %c384_30 = arith.constant 384 : index
    %54 = vector.load %arg6[%c0_29, %c384_30] : memref<16x640xf32, #tpu.memory_space<vmem>>, vector<16x128xf32>
    tpu.vector_store %arg6[%c0_29, %c384_30], %53 {strides = array<i32>} : memref<16x640xf32, #tpu.memory_space<vmem>>, vector<16x128xf32>,
    %c0_31 = arith.constant 0 : index
    %c512 = arith.constant 512 : index
    %55 = vector.load %arg6[%c0_31, %c512] : memref<16x640xf32, #tpu.memory_space<vmem>>, vector<16x128xf32>
    %cst_32 = arith.constant 0.000000e+00 : f32
    %56 = vector.broadcast %cst_32 : f32 to vector<16x128xf32>
    %57 = arith.select %27, %11, %56 : vector<16x128xi1>, vector<16x128xf32>
    %58 = arith.addf %55, %57 : vector<16x128xf32>
    %c0_33 = arith.constant 0 : index
    %c512_34 = arith.constant 512 : index
    %59 = vector.load %arg6[%c0_33, %c512_34] : memref<16x640xf32, #tpu.memory_space<vmem>>, vector<16x128xf32>
    tpu.vector_store %arg6[%c0_33, %c512_34], %58 {strides = array<i32>} : memref<16x640xf32, #tpu.memory_space<vmem>>, vector<16x128xf32>,
    return
  }
  func.func @transform_0(%arg0: i32, %arg1: i32) -> (i32, i32) {
    %c0_i32 = arith.constant 0 : i32
    %c0_i32_0 = arith.constant 0 : i32
    return %arg0, %c0_i32 : i32, i32
  }
  func.func @transform_1(%arg0: i32, %arg1: i32) -> (i32, i32, i32) {
    %c0_i32 = arith.constant 0 : i32
    %c0_i32_0 = arith.constant 0 : i32
    %c0_i32_1 = arith.constant 0 : i32
    return %arg1, %c0_i32, %c0_i32_0 : i32, i32, i32
  }
  func.func @transform_2(%arg0: i32, %arg1: i32) -> (i32, i32) {
    %c0_i32 = arith.constant 0 : i32
    %c0_i32_0 = arith.constant 0 : i32
    return %arg0, %c0_i32 : i32, i32
  }
  func.func @transform_3(%arg0: i32, %arg1: i32) -> (i32, i32) {
    %c0_i32 = arith.constant 0 : i32
    %c0_i32_0 = arith.constant 0 : i32
    return %c0_i32, %arg1 : i32, i32
  }
  func.func @transform_4(%arg0: i32, %arg1: i32) -> (i32, i32) {
    %c0_i32 = arith.constant 0 : i32
    %c0_i32_0 = arith.constant 0 : i32
    return %arg0, %c0_i32 : i32, i32
  }
}

</mosaic_0001>

<bundles_post_ra>
// kernel: tpu_custom_call.1
= control target key start
LH: loop header
LB: loop body
LE: loop exit
PB: predicated region body
PF: predicated region fallthrough
CT: control target
= control target key end

     0   :  { %9 = vsyncpa [#allocation3], 0  ;;  %s399_s0 = inlined_call_operand.hbm [shape: bf16[16,32], index: 0, kind: input, shape index: {}]   ;;  %s400_s1 = inlined_call_operand.vmem [shape: bf16[1,32,128], index: 1, kind: input, shape index: {}]   ;;  %s401_s2 = inlined_call_operand.vmem [shape: s32[16,1], index: 2, kind: input, shape index: {}]   ;;  %s402_s3 = inlined_call_operand.vmem [shape: s32[1,128], index: 3, kind: input, shape index: {}]   ;;  %s403_s4 = inlined_call_operand.hbm [shape: f32[16,640], index: 4, kind: output, shape index: {}]  }
   0x1   :  { %10 = vsyncpa [#allocation4], 0  ;;  %s298_s15 = smov [#allocation2]   ;;  %s250_s19 = scalar_lea.hbm %s399_s0, 128 }
   0x2   :  { %s16_s16 = sshll.u32 %s298_s15, 4  ;;  %p251_p0 = scmp.ne.s32.totalorder %s399_s0, %s250_s19  ;;  %s17_s16 = int_to_ptr.vmem [resolvable:$true] %s16_s16 }
   0x3   :  { %p254_p1 = scmp.lt.u32.totalorder %s250_s19, %s399_s0 }
   0x5   :  { %p256_p2 = pnand %p254_p1, %p251_p0 }
   0x7   :  { %259 = shalt.err (!%p256_p2)
}
   0x8   :  { %s260_s24 = scalar_lea.vmem %s17_s16, 128  ;;  %p265_p4 = scmp.lt.s32.totalorder %s17_s16, %s17_s16 }
   0x9   :  { %p261_p3 = scmp.ne.s32.totalorder %s17_s16, %s260_s24  ;;  %p266_p5 = scmp.lt.s32.totalorder %s260_s24, %s260_s24 }
   0xb   :  { %p267_p6 = por %p266_p5, %p265_p4 }
   0xd   :  { %p268_p7 = pnand %p267_p6, %p261_p3 }
   0xf   :  { %271 = shalt.err (!%p268_p7)
}
  0x10   :  { %s299_s25 = smov 64   ;;  %s300_s26 = smov 4  }
  0x11   :  { %22 = dma.hbm_to_vmem [thread:$0]  %s399_s0, 128, %s17_s16, [#allocation3], %s299_s25, %s299_s25, %s300_s26  }
  0x12   :  { %294 = dma.done.wait [#allocation3], 128  }
  0x13   :  { %295 = vsyncadd [#allocation3], 4294967168  ;;  %v301_v0 = vmov 0.0   ;;  %vm302_vm0 = vmmov 0   ;;  %v303_v1 = vmov 0   ;;  %v243_v2 = vld [vmem:[%s400_s1] sm:$0xff]   ;;  %v141_v7 = vlaneseq }
  0x14   :  { %225 = vmatprep.subr.bf16.mxu0 %v301_v0  ;;  %229 = vmatprep.mubr.msk.bf16.mxu0 %vm302_vm0, %v301_v0  ;;  %v244_v3 = vld [vmem:[%s400_s1 + $0x8] sm:$0xff]   ;;  %v115_v4 = vld [vmem:[%s401_s2] sm:$0xff]  ;;  %vm70_vm1 = vcmask 261120  }
  0x15   :  { %242 = vset.pattern.permute.xlu0 %v303_v1  ;;  %226 = vmatpush3.bf16.msra.mxu0 %v243_v2  ;;  %v245_v5 = vld [vmem:[#allocation2] sm:$0xff]   ;;  %v116_v6 = vld [vmem:[%s401_s2 + $0x8] sm:$0xff]  ;;  %v142_v9 = vand.u32 127, %v141_v7  ;;  %s304_s2 = smov [#allocation5]  }
  0x16   :  { %227 = vmatprep.subr.bf16.mxu0 %v301_v0  ;;  %123 = vperm.xlu0 %242, %v115_v4   ;;  %v221_v10 = vld [vmem:[%s402_s3] ss:$0 sm:$0xff]  ;;  %s203_s3 = sshll.u32 %s304_s2, 4  ;;  %s204_s3 = int_to_ptr.vmem [resolvable:$true] %s203_s3 }
  0x17   :  { %vm145_vm2 = vcmp.lt.s32.totalorder %v142_v9, 8  ;;  %s272_s11 = scalar_lea.vmem %s204_s3, 1280  ;;  %p277_p9 = scmp.lt.s32.totalorder %s204_s3, %s204_s3 }
  0x18   :  { %p273_p8 = scmp.ne.s32.totalorder %s204_s3, %s272_s11  ;;  %p278_p10 = scmp.lt.s32.totalorder %s272_s11, %s272_s11 }
  0x19   :  { %228 = vmatpush3.bf16.msra.mxu0 %v244_v3 }
  0x1a   :  { %126 = vperm.xlu0 %242, %v116_v6   ;;  %p279_p11 = por %p278_p10, %p277_p9 }
  0x1c   :  { %230 = vmatmul.mubr.msk.bf16.vlgmr.msra.gmra.mrb[0].mxu0 %vm70_vm1, %v245_v5  ;;  %p280_p12 = pnand %p279_p11, %p273_p8 }
  0x95   :  { %v124_v8 = vpop.permute.xlu0 %123 }
  0x96   :  { %vm132_vm3 = vcmp.eq.s32.totalorder %v124_v8, %v221_v10 }
  0x97   :  { %vm361_vm4 = vmand %vm132_vm3, %vm145_vm2 }
  0x99   :  { %v127_v11 = vpop.permute.xlu0 %126 }
  0x9a   :  { %vm133_vm5 = vcmp.eq.s32.totalorder %v127_v11, %v221_v10 }
  0x9b   :  { %vm369_vm6 = vmand %vm133_vm5, %vm145_vm2 }
  0xef   :  { %v108_v13 = vpop.f32.mrb[0].mxu0 }
  0xf0   :  { %v219_v14 = vclamps-f32 %v108_v13, 1.0  ;;  %v231_v15 = vpop.f32.mrb[1].mxu0 }
  0xf1   :  { %v111_v16 = vpop.f32.mrb[2].mxu0 }
  0xf2   :  { %v134_v17 = vmul.f32 14.285714, %v219_v14  ;;  %v192_v18 = vsel %vm361_vm4, %v219_v14, 0.0  ;;  %v232_v19 = vpop.f32.mrb[3].mxu0  ;;  %v220_v21 = vclamps-f32 %v111_v16, 1.0  ;;  %v152_v26 = vsub.f32 1.0, %v219_v14 }
  0xf3   :  { %196 = vst [vmem:[#allocation5 + $0x20] sm:$0xff] %v192_v18  ;;  %v154_v27 = vmax.f32 %v219_v14, 0.0 }
  0xf4   :  { %v136_v22 = vmul.f32 1.442695, %v134_v17  ;;  %v135_v23 = vmul.f32 14.285714, %v220_v21  ;;  %v193_v24 = vsel %vm369_vm6, %v220_v21, 0.0  ;;  %v153_v28 = vsub.f32 1.0, %v220_v21 }
  0xf5   :  { %197 = vst [vmem:[#allocation5 + $0x48] sm:$0xff] %v193_v24  ;;  %v155_v29 = vmax.f32 %v220_v21, 0.0  ;;  %v156_v30 = vsel %vm132_vm3, %v152_v26, %v154_v27 }
  0xf6   :  { %246 = vpow2.f32 %v136_v22  ;;  %v138_v25 = vmul.f32 1.442695, %v135_v23  ;;  %v158_v32 = vmul.f32 %v156_v30, %v156_v30 }
  0xf7   :  { %v157_v33 = vsel %vm133_vm5, %v153_v28, %v155_v29 }
  0xf8   :  { %248 = vpow2.f32 %v138_v25  ;;  %v159_v38 = vmul.f32 %v157_v33, %v157_v33 }
 0x100   :  { %v247_v31 = vpop.eup %246 }
 0x101   :  { %v150_v34 = vsel %vm145_vm2, %v247_v31, 0.0 }
 0x102   :  { %v160_v35 = vmul.f32 %v158_v32, %v150_v34  ;;  %v178_v36 = vsel %vm361_vm4, %v150_v34, 0.0  ;;  %v249_v37 = vpop.eup %248  ;;  %188 = vst [vmem:[#allocation5 + $0x18] sm:$0xff] %v150_v34 }
 0x103   :  { %v151_v40 = vsel %vm145_vm2, %v249_v37, 0.0  ;;  %182 = vst [vmem:[#allocation5 + $0x10] sm:$0xff] %v178_v36 }
 0x104   :  { %v164_v39 = vsel %vm361_vm4, %v160_v35, 0.0  ;;  %v161_v41 = vmul.f32 %v159_v38, %v151_v40  ;;  %v179_v42 = vsel %vm369_vm6, %v151_v40, 0.0  ;;  %174 = vst [vmem:[#allocation5 + $0x8] sm:$0xff] %v160_v35  ;;  %189 = vst [vmem:[#allocation5 + $0x40] sm:$0xff] %v151_v40 }
 0x105   :  { %168 = vst [vmem:[#allocation5] sm:$0xff] %v164_v39  ;;  %183 = vst [vmem:[#allocation5 + $0x38] sm:$0xff] %v179_v42 }
 0x106   :  { %v165_v43 = vsel %vm369_vm6, %v161_v41, 0.0  ;;  %175 = vst [vmem:[#allocation5 + $0x30] sm:$0xff] %v161_v41 }
 0x107   :  { %169 = vst [vmem:[#allocation5 + $0x28] sm:$0xff] %v165_v43 }
 0x108   :  { %283 = shalt.err (!%p280_p12)
}
 0x109   :  { %s284_s14 = scalar_lea.hbm %s403_s4, 1280 }
 0x10a   :  { %p285_p13 = scmp.ne.s32.totalorder %s403_s4, %s284_s14  ;;  %p288_p0 = scmp.lt.u32.totalorder %s284_s14, %s403_s4 }
 0x10c   :  { %p290_p1 = pnand %p288_p0, %p285_p13 }
 0x10e   :  { %293 = shalt.err (!%p290_p1)
}
 0x10f   :  { %s305_s19 = smov 640   ;;  %s306_s20 = smov 40  }
 0x110   :  { %209 = dma.vmem_to_hbm [thread:$0]  %s204_s3, 1280, %s403_s4, [#allocation4], %s305_s19, %s305_s19, %s306_s20  }
 0x111   :  { %296 = dma.done.wait [#allocation4], 1280  }
 0x112   :  { %297 = vsyncadd [#allocation4], 4294966016 }
 0x113   :  { %213 = vsyncpa [#allocation3], 1 }
 0x114   :  { %214 = vsyncpa [#allocation4], 1 }

</bundles_post_ra>
